<compile_context>
chip_gen: v5e
topology: v5e:2x2
jax: 0.10.0
libtpu: 0.0.40
codegen_flags: <defaults>
</compile_context>

<pallas_src>
import functools

import jax
import jax.numpy as jnp
from jax import lax
from jax.experimental import pallas as pl
from jax.experimental.pallas import tpu as pltpu

_LANE = 128
_MIB = 1024 * 1024


# ---------------------------------------------------------------------------
# Shared epilogue: softmax / KL math on the full association matrix W.
# ---------------------------------------------------------------------------
def _epilogue(W, ycol, yrow, walker_weight, visit_weight):
    """W: (Ns, Nt) f32; ycol: (Ns, 1); yrow: (1, Ns).  Returns (1, 1) f32."""
    ns, nt = W.shape

    # Pst = softmax over rows of W (dim=1).
    row_max = jnp.max(W, axis=1, keepdims=True)
    e_row = jnp.exp(W - row_max)
    Pst = e_row / jnp.sum(e_row, axis=1, keepdims=True)            # (Ns, Nt)

    # Pts = softmax over rows of W^T == columns of W, kept in (Ns, Nt) layout
    # (col_sm[i, j] == Pts[j, i]) so no transpose is materialized.
    col_max = jnp.max(W, axis=0, keepdims=True)
    e_col = jnp.exp(W - col_max)
    col_sm = e_col / jnp.sum(e_col, axis=0, keepdims=True)          # (Ns, Nt)

    # Psts = Pst @ Pts = Pst @ col_sm^T -> (Ns, Ns)
    Psts = lax.dot_general(Pst, col_sm, (((1,), (1,)), ((), ())),
                           preferred_element_type=jnp.float32)

    # Pt = mean over source rows -> (1, Nt)
    Pt = jnp.mean(Pst, axis=0, keepdims=True)

    # ---------------- Walker loss ----------------
    eq = (ycol == yrow).astype(jnp.float32)                          # (Ns, Ns)
    row_sum = jnp.sum(eq, axis=1, keepdims=True)                     # >= 1 (diag)
    # For eq > 0: p_target == 1/row_sum, so log(p_target) == -log(row_sum)
    # (avoids a second (Ns, Ns) log pass and a select).
    log_psts = jnp.log(1e-8 + Psts)
    kl_walker = jnp.where(eq > 0.0,
                          (eq / row_sum) * (-jnp.log(row_sum) - log_psts),
                          0.0)
    L_walker = jnp.sum(kl_walker, keepdims=True) / float(ns)         # (1, 1)

    # ---------------- Visit loss ----------------
    p_visit = 1.0 / float(nt)
    kl_visit = p_visit * (jnp.log(p_visit) - jnp.log(1e-8 + Pt))     # (1, Nt)
    L_visit = jnp.sum(kl_visit, keepdims=True)                       # (1, 1)

    return visit_weight * L_visit + walker_weight * L_walker


# ---------------------------------------------------------------------------
# Kernels
# ---------------------------------------------------------------------------
def _single_block_kernel(xs_ref, xt_ref, ycol_ref, yrow_ref, out_ref,
                         *, walker_weight, visit_weight):
    # Fast path: whole D fits one tile -> no grid / accumulator machinery.
    W = lax.dot_general(xs_ref[...], xt_ref[...], (((1,), (1,)), ((), ())),
                        preferred_element_type=jnp.float32)
    out_ref[...] = _epilogue(W, ycol_ref[...], yrow_ref[...],
                             walker_weight, visit_weight)


def _reduce_kernel(xs_ref, xt_ref, ycol_ref, yrow_ref, out_ref, w_acc,
                   *, walker_weight, visit_weight):
    k = pl.program_id(0)

    @pl.when(k == 0)
    def _():
        w_acc[...] = jnp.zeros_like(w_acc)

    # Partial W += xs_tile @ xt_tile^T on the MXU (native-dtype inputs, f32 acc).
    w_acc[...] += lax.dot_general(xs_ref[...], xt_ref[...],
                                  (((1,), (1,)), ((), ())),
                                  preferred_element_type=jnp.float32)

    @pl.when(k == pl.num_programs(0) - 1)
    def _():
        out_ref[...] = _epilogue(w_acc[...], ycol_ref[...], yrow_ref[...],
                                 walker_weight, visit_weight)


def _partial_w_kernel(xs_ref, xt_ref, w_ref):
    # Phase 1 of the dual-TensorCore path: each "parallel" index c accumulates
    # its slice of the D reduction directly into its own (1, Ns, Nt) output
    # block (resident in VMEM across the inner "arbitrary" k axis).
    @pl.when(pl.program_id(1) == 0)
    def _():
        w_ref[...] = jnp.zeros_like(w_ref)

    w_ref[...] += lax.dot_general(xs_ref[...], xt_ref[...],
                                  (((1,), (1,)), ((), ())),
                                  preferred_element_type=jnp.float32)[None]


def _combine_epilogue_kernel(w_parts_ref, ycol_ref, yrow_ref, out_ref,
                             *, walker_weight, visit_weight):
    W = jnp.sum(w_parts_ref[...], axis=0)                            # (Ns, Nt)
    out_ref[...] = _epilogue(W, ycol_ref[...], yrow_ref[...],
                             walker_weight, visit_weight)


# ---------------------------------------------------------------------------
# Wrapper
# ---------------------------------------------------------------------------
def _vmem_budget_bytes():
    phys = 64 * _MIB          # conservative default: v7x has 64 MiB per TensorCore
    try:
        phys = int(pltpu.get_tpu_info().vmem_capacity_bytes)
    except Exception:
        pass
    phys = max(32 * _MIB, min(phys, 128 * _MIB))
    return (3 * phys) // 4    # 25% headroom: ~48 MiB on v7x, ~96 MiB on v5e/v6e


def associative_loss(xs, xt, y, walker_weight=1.0, visit_weight=1.0,
                     block_k=None, stream_bf16=False, num_w_partials=1):
    """Pallas implementation of AssociativeLoss.forward(xs, xt, y).

    stream_bf16:    opt-in bf16 downcast of float inputs for the HBM stream
                    (the loop is bandwidth-bound; the MXU accumulates in f32).
    num_w_partials: >1 splits the D reduction across a leading "parallel" grid
                    axis (use 2 on v7x to feed both TensorCores) with a tiny
                    second pallas_call for the combine + epilogue.
    """
    Ns = xs.shape[0]
    Nt = xt.shape[0]
    xs_f = xs.reshape(Ns, -1)              # keep native dtype (bf16-friendly)
    xt_f = xt.reshape(Nt, -1)
    D = xs_f.shape[1]
    assert xt_f.shape[1] == D, "xs/xt flattened feature dims must match"

    if stream_bf16:
        if jnp.issubdtype(xs_f.dtype, jnp.floating) and xs_f.dtype != jnp.bfloat16:
            xs_f = xs_f.astype(jnp.bfloat16)
        if jnp.issubdtype(xt_f.dtype, jnp.floating) and xt_f.dtype != jnp.bfloat16:
            xt_f = xt_f.astype(jnp.bfloat16)

    itemsize = max(jnp.dtype(xs_f.dtype).itemsize, jnp.dtype(xt_f.dtype).itemsize)
    d_round = ((D + _LANE - 1) // _LANE) * _LANE

    # --- honest VMEM accounting: budget minus accumulator + epilogue set ----
    budget = _vmem_budget_bytes()
    acc_bytes = max(1, num_w_partials) * Ns * Nt * 4
    epi_bytes = (3 * Ns * Nt + 2 * Ns * Ns + 4 * max(Ns, Nt)) * 4
    fixed = acc_bytes + epi_bytes + 2 * _MIB        # + slack for Mosaic internals
    tile_budget = max(budget - fixed, 4 * _MIB)

    n_buf = 3                                        # triple-buffered streams
    per_col = n_buf * (Ns + Nt) * itemsize

    if block_k is None:
        floor_k = max(_LANE, min(4 * _LANE, d_round))   # >= 512 when D allows
        bk = (tile_budget // per_col) // _LANE * _LANE
        block_k = max(floor_k, min(bk, 16 * _LANE))     # cap at 2048
    block_k = max(_LANE, (block_k // _LANE) * _LANE)
    block_k = min(block_k, d_round)

    # Dual-core split: each partial needs at least one 128-wide tile.
    num_w_partials = int(max(1, num_w_partials))
    if num_w_partials > 1:
        per_part = (d_round // num_w_partials) // _LANE * _LANE
        if per_part < _LANE:
            num_w_partials = 1
        else:
            block_k = min(block_k, per_part)

    # Pad D with zeros (neutral in xs @ xt^T) so every partial sees whole tiles.
    step = block_k * num_w_partials
    D_pad = ((D + step - 1) // step) * step
    if D_pad != D:
        xs_f = jnp.pad(xs_f, ((0, 0), (0, D_pad - D)))
        xt_f = jnp.pad(xt_f, ((0, 0), (0, D_pad - D)))

    n_k = D_pad // block_k
    k_per_part = n_k // num_w_partials

    # Labels: exact integer compare for class-index labels, float otherwise.
    y_flat = y.reshape(-1)
    if jnp.issubdtype(y_flat.dtype, jnp.integer) or y_flat.dtype == jnp.bool_:
        y_flat = y_flat.astype(jnp.int32)
    else:
        y_flat = y_flat.astype(jnp.float32)
    y_col = y_flat.reshape(Ns, 1)
    y_row = y_flat.reshape(1, Ns)

    vmem_limit = int(budget)
    weights = dict(walker_weight=float(walker_weight),
                   visit_weight=float(visit_weight))

    # ---------------- Fast path: whole D in one tile ----------------
    if num_w_partials == 1 and n_k == 1:
        out = pl.pallas_call(
            functools.partial(_single_block_kernel, **weights),
            out_shape=jax.ShapeDtypeStruct((1, 1), jnp.float32),
            compiler_params=pltpu.CompilerParams(vmem_limit_bytes=vmem_limit),
        )(xs_f, xt_f, y_col, y_row)
        return out[0, 0]

    # ---------------- Single-core D-tiled reduction ----------------
    if num_w_partials == 1:
        def _stream_spec(rows):
            if n_k > 2:
                return pl.BlockSpec((rows, block_k), lambda k: (0, k),
                                    pipeline_mode=pl.Buffered(3))
            return pl.BlockSpec((rows, block_k), lambda k: (0, k))

        out = pl.pallas_call(
            functools.partial(_reduce_kernel, **weights),
            out_shape=jax.ShapeDtypeStruct((1, 1), jnp.float32),
            grid_spec=pltpu.PrefetchScalarGridSpec(
                num_scalar_prefetch=0,
                grid=(n_k,),
                in_specs=[
                    _stream_spec(Ns),
                    _stream_spec(Nt),
                    pl.BlockSpec((Ns, 1), lambda k: (0, 0)),
                    pl.BlockSpec((1, Ns), lambda k: (0, 0)),
                ],
                out_specs=pl.BlockSpec((1, 1), lambda k: (0, 0)),
                scratch_shapes=[pltpu.VMEM((Ns, Nt), jnp.float32)],
            ),
            compiler_params=pltpu.CompilerParams(
                dimension_semantics=("arbitrary",),     # D is a reduction axis
                vmem_limit_bytes=vmem_limit,
            ),
        )(xs_f, xt_f, y_col, y_row)
        return out[0, 0]

    # ---------------- Dual-TensorCore split (v7x): partial W + epilogue ----
    def _split_stream_spec(rows):
        idx = lambda c, k: (0, c * k_per_part + k)
        if k_per_part > 2:
            return pl.BlockSpec((rows, block_k), idx, pipeline_mode=pl.Buffered(3))
        return pl.BlockSpec((rows, block_k), idx)

    w_parts = pl.pallas_call(
        _partial_w_kernel,
        out_shape=jax.ShapeDtypeStruct((num_w_partials, Ns, Nt), jnp.float32),
        grid_spec=pltpu.PrefetchScalarGridSpec(
            num_scalar_prefetch=0,
            grid=(num_w_partials, k_per_part),
            in_specs=[_split_stream_spec(Ns), _split_stream_spec(Nt)],
            out_specs=pl.BlockSpec((1, Ns, Nt), lambda c, k: (c, 0, 0)),
        ),
        compiler_params=pltpu.CompilerParams(
            dimension_semantics=("parallel", "arbitrary"),
            vmem_limit_bytes=vmem_limit,
        ),
    )(xs_f, xt_f)

    out = pl.pallas_call(
        functools.partial(_combine_epilogue_kernel, **weights),
        out_shape=jax.ShapeDtypeStruct((1, 1), jnp.float32),
        compiler_params=pltpu.CompilerParams(vmem_limit_bytes=vmem_limit),
    )(w_parts, y_col, y_row)
    return out[0, 0]


# ---------------------------------------------------------------------------
# Pure-JAX reference mirroring the PyTorch module (for a sanity check).
# ---------------------------------------------------------------------------
def _reference_loss(xs, xt, y, walker_weight=1.0, visit_weight=1.0):
    Ns, Nt = xs.shape[0], xt.shape[0]
    xs_f = xs.reshape(Ns, -1).astype(jnp.float32)
    xt_f = xt.reshape(Nt, -1).astype(jnp.float32)
    W = xs_f @ xt_f.T
    Pst = jax.nn.softmax(W, axis=1)
    Pts = jax.nn.softmax(W.T, axis=1)
    Psts = Pst @ Pts
    Pt = jnp.mean(Pst, axis=0, keepdims=True)

    eq = (y.reshape(-1, 1) == y.reshape(1, -1)).astype(jnp.float32)
    p_target = eq / jnp.sum(eq, axis=1, keepdims=True)
    log_psts = jnp.log(1e-8 + Psts)
    kl_w = jnp.where(eq > 0,
                     p_target * (jnp.log(jnp.where(eq > 0, p_target, 1.0))
                                 - log_psts), 0.0)
    L_walker = jnp.sum(kl_w) / Ns

    p_visit = 1.0 / Nt
    L_visit = jnp.sum(p_visit * (jnp.log(p_visit) - jnp.log(1e-8 + Pt)))
    return visit_weight * L_visit + walker_weight * L_walker


if __name__ == "__main__":
    key = jax.random.PRNGKey(0)
    k_xs, k_xt, k_y = jax.random.split(key, 3)

    Ns, Nt, C, H, Wd = 8, 8, 4, 16, 16            # flattened feature dim D = 1024
    xs = 0.05 * jax.random.normal(k_xs, (Ns, C, H, Wd), dtype=jnp.float32)
    xt = 0.05 * jax.random.normal(k_xt, (Nt, C, H, Wd), dtype=jnp.float32)
    y = jax.random.randint(k_y, (Ns,), 0, 4, dtype=jnp.int32)

    ref = _reference_loss(xs, xt, y)

    # 1) Default auto-tiling: D=1024 fits one tile -> single-invocation fast path.
    loss_fast = associative_loss(xs, xt, y)
    jax.block_until_ready(loss_fast)
    assert jnp.isfinite(loss_fast)
    assert jnp.allclose(loss_fast, ref, rtol=1e-4, atol=1e-5), (loss_fast, ref)

    # 2) Tiled D reduction (block_k=256 -> 4 steps, triple-buffered streams).
    loss_tiled = associative_loss(xs, xt, y, block_k=256)
    jax.block_until_ready(loss_tiled)
    assert jnp.allclose(loss_tiled, ref, rtol=1e-4, atol=1e-5), (loss_tiled, ref)

    # 3) Dual-TensorCore layout (partial-W phase + tiny epilogue call).
    loss_split = associative_loss(xs, xt, y, block_k=256, num_w_partials=2)
    jax.block_until_ready(loss_split)
    assert jnp.allclose(loss_split, ref, rtol=1e-4, atol=1e-5), (loss_split, ref)

    # 4) Opt-in bf16 streaming (halves HBM traffic; slightly different numerics).
    loss_bf16 = associative_loss(xs, xt, y, stream_bf16=True)
    jax.block_until_ready(loss_bf16)
    assert jnp.allclose(loss_bf16, ref, rtol=2e-2, atol=2e-2), (loss_bf16, ref)

    print("KERNEL_OK")
</pallas_src>

<mosaic_0001>
module attributes {stable_mosaic.version = 11 : i64} {
  func.func @_single_block_kernel(%arg0: memref<8x1024xf32, #tpu.memory_space<vmem>>, %arg1: memref<8x1024xf32, #tpu.memory_space<vmem>>, %arg2: memref<8x1xi32, #tpu.memory_space<vmem>>, %arg3: memref<1x8xi32, #tpu.memory_space<vmem>>, %arg4: memref<1x1xf32, #tpu.memory_space<vmem>>) attributes {dimension_semantics = [], scalar_prefetch = 0 : i64, scratch_operands = 0 : i64, tpu.core_type = #tpu.core_type<tc>} {
    %c0 = arith.constant 0 : index
    %c0_0 = arith.constant 0 : index
    %0 = vector.load %arg0[%c0, %c0_0] : memref<8x1024xf32, #tpu.memory_space<vmem>>, vector<8x1024xf32>
    %c0_1 = arith.constant 0 : index
    %c0_2 = arith.constant 0 : index
    %1 = vector.load %arg1[%c0_1, %c0_2] : memref<8x1024xf32, #tpu.memory_space<vmem>>, vector<8x1024xf32>
    %cst = arith.constant dense<0.000000e+00> : vector<8x8xf32>
    %2 = tpu.matmul %0, %1, %cst {dimension_numbers = #tpu.dot_dimension_numbers<[1], [1], [0], [0], [0, 0, 1, 0], [], []>} : vector<8x1024xf32>, vector<8x1024xf32>, vector<8x8xf32> -> vector<8x8xf32>
    %c0_3 = arith.constant 0 : index
    %c0_4 = arith.constant 0 : index
    %3 = vector.load %arg2[%c0_3, %c0_4] : memref<8x1xi32, #tpu.memory_space<vmem>>, vector<8x1xi32>
    %c0_5 = arith.constant 0 : index
    %c0_6 = arith.constant 0 : index
    %4 = vector.load %arg3[%c0_5, %c0_6] : memref<1x8xi32, #tpu.memory_space<vmem>>, vector<1x8xi32>
    %cst_7 = arith.constant dense<0xFF800000> : vector<8xf32>
    %5 = vector.multi_reduction <maximumf>, %2, %cst_7 [1] : vector<8x8xf32> to vector<8xf32>
    %6 = vector.shape_cast %5 : vector<8xf32> to vector<8x1xf32>
    %7 = vector.broadcast %6 : vector<8x1xf32> to vector<8x8xf32>
    %8 = arith.subf %2, %7 : vector<8x8xf32>
    %9 = math.exp %8 : vector<8x8xf32>
    %cst_8 = arith.constant dense<0.000000e+00> : vector<8xf32>
    %10 = vector.multi_reduction <add>, %9, %cst_8 [1] : vector<8x8xf32> to vector<8xf32>
    %11 = vector.shape_cast %10 : vector<8xf32> to vector<8x1xf32>
    %12 = vector.broadcast %11 : vector<8x1xf32> to vector<8x8xf32>
    %13 = arith.divf %9, %12 : vector<8x8xf32>
    %cst_9 = arith.constant dense<0xFF800000> : vector<8xf32>
    %14 = vector.multi_reduction <maximumf>, %2, %cst_9 [0] : vector<8x8xf32> to vector<8xf32>
    %15 = vector.shape_cast %14 : vector<8xf32> to vector<1x8xf32>
    %16 = vector.broadcast %15 : vector<1x8xf32> to vector<8x8xf32>
    %17 = arith.subf %2, %16 : vector<8x8xf32>
    %18 = math.exp %17 : vector<8x8xf32>
    %cst_10 = arith.constant dense<0.000000e+00> : vector<8xf32>
    %19 = vector.multi_reduction <add>, %18, %cst_10 [0] : vector<8x8xf32> to vector<8xf32>
    %20 = vector.shape_cast %19 : vector<8xf32> to vector<1x8xf32>
    %21 = vector.broadcast %20 : vector<1x8xf32> to vector<8x8xf32>
    %22 = arith.divf %18, %21 : vector<8x8xf32>
    %cst_11 = arith.constant dense<0.000000e+00> : vector<8x8xf32>
    %23 = tpu.matmul %13, %22, %cst_11 {dimension_numbers = #tpu.dot_dimension_numbers<[1], [1], [0], [0], [0, 0, 1, 0], [], []>} : vector<8x8xf32>, vector<8x8xf32>, vector<8x8xf32> -> vector<8x8xf32>
    %cst_12 = arith.constant dense<0.000000e+00> : vector<8xf32>
    %24 = vector.multi_reduction <add>, %13, %cst_12 [0] : vector<8x8xf32> to vector<8xf32>
    %25 = vector.shape_cast %24 : vector<8xf32> to vector<1x8xf32>
    %cst_13 = arith.constant 8.000000e+00 : f32
    %26 = vector.broadcast %cst_13 : f32 to vector<1x8xf32>
    %27 = arith.divf %25, %26 : vector<1x8xf32>
    %28 = vector.broadcast %3 : vector<8x1xi32> to vector<8x8xi32>
    %29 = vector.broadcast %4 : vector<1x8xi32> to vector<8x8xi32>
    %30 = arith.cmpi eq, %28, %29 : vector<8x8xi32>
    %31 = arith.extui %30 : vector<8x8xi1> to vector<8x8xi32>
    %32 = arith.sitofp %31 : vector<8x8xi32> to vector<8x8xf32>
    %cst_14 = arith.constant dense<0.000000e+00> : vector<8xf32>
    %33 = vector.multi_reduction <add>, %32, %cst_14 [1] : vector<8x8xf32> to vector<8xf32>
    %34 = vector.shape_cast %33 : vector<8xf32> to vector<8x1xf32>
    %cst_15 = arith.constant 9.99999993E-9 : f32
    %35 = vector.broadcast %cst_15 : f32 to vector<8x8xf32>
    %36 = arith.addf %35, %23 : vector<8x8xf32>
    %37 = math.log %36 : vector<8x8xf32>
    %cst_16 = arith.constant 0.000000e+00 : f32
    %38 = vector.broadcast %cst_16 : f32 to vector<8x8xf32>
    %39 = arith.cmpf ogt, %32, %38 : vector<8x8xf32>
    %40 = vector.broadcast %34 : vector<8x1xf32> to vector<8x8xf32>
    %41 = arith.divf %32, %40 : vector<8x8xf32>
    %42 = math.log %34 : vector<8x1xf32>
    %cst_17 = arith.constant 0.000000e+00 : f32
    %43 = vector.broadcast %cst_17 : f32 to vector<8x1xf32>
    %44 = arith.subf %43, %42 : vector<8x1xf32>
    %45 = vector.broadcast %44 : vector<8x1xf32> to vector<8x8xf32>
    %46 = arith.subf %45, %37 : vector<8x8xf32>
    %47 = arith.mulf %41, %46 : vector<8x8xf32>
    %cst_18 = arith.constant 0.000000e+00 : f32
    %48 = vector.broadcast %cst_18 : f32 to vector<8x8xf32>
    %49 = arith.select %39, %47, %48 : vector<8x8xi1>, vector<8x8xf32>
    %50 = vector.shape_cast %49 : vector<8x8xf32> to vector<1x8x8xf32>
    %cst_19 = arith.constant dense<0.000000e+00> : vector<1xf32>
    %51 = vector.multi_reduction <add>, %50, %cst_19 [1, 2] : vector<1x8x8xf32> to vector<1xf32>
    %52 = vector.shape_cast %51 : vector<1xf32> to vector<1x1x1xf32>
    %53 = vector.extract %52[0, 0, 0] : f32 from vector<1x1x1xf32>
    %54 = vector.broadcast %53 : f32 to vector<1x1xf32>
    %cst_20 = arith.constant 8.000000e+00 : f32
    %55 = vector.broadcast %cst_20 : f32 to vector<1x1xf32>
    %56 = arith.divf %54, %55 : vector<1x1xf32>
    %cst_21 = arith.constant 1.250000e-01 : f32
    %57 = math.log %cst_21 : f32
    %cst_22 = arith.constant 9.99999993E-9 : f32
    %58 = vector.broadcast %cst_22 : f32 to vector<1x8xf32>
    %59 = arith.addf %58, %27 : vector<1x8xf32>
    %60 = math.log %59 : vector<1x8xf32>
    %61 = vector.broadcast %57 : f32 to vector<1x8xf32>
    %62 = arith.subf %61, %60 : vector<1x8xf32>
    %cst_23 = arith.constant 1.250000e-01 : f32
    %63 = vector.broadcast %cst_23 : f32 to vector<1x8xf32>
    %64 = arith.mulf %63, %62 : vector<1x8xf32>
    %65 = vector.shape_cast %64 : vector<1x8xf32> to vector<1x1x8xf32>
    %cst_24 = arith.constant dense<0.000000e+00> : vector<1xf32>
    %66 = vector.multi_reduction <add>, %65, %cst_24 [1, 2] : vector<1x1x8xf32> to vector<1xf32>
    %67 = vector.shape_cast %66 : vector<1xf32> to vector<1x1x1xf32>
    %68 = vector.extract %67[0, 0, 0] : f32 from vector<1x1x1xf32>
    %69 = vector.broadcast %68 : f32 to vector<1x1xf32>
    %cst_25 = arith.constant 1.000000e+00 : f32
    %70 = vector.broadcast %cst_25 : f32 to vector<1x1xf32>
    %71 = arith.mulf %70, %69 : vector<1x1xf32>
    %cst_26 = arith.constant 1.000000e+00 : f32
    %72 = vector.broadcast %cst_26 : f32 to vector<1x1xf32>
    %73 = arith.mulf %72, %56 : vector<1x1xf32>
    %74 = arith.addf %71, %73 : vector<1x1xf32>
    %c0_27 = arith.constant 0 : index
    %c0_28 = arith.constant 0 : index
    %75 = vector.load %arg4[%c0_27, %c0_28] : memref<1x1xf32, #tpu.memory_space<vmem>>, vector<1x1xf32>
    tpu.vector_store %arg4[%c0_27, %c0_28], %74 {strides = array<i32>} : memref<1x1xf32, #tpu.memory_space<vmem>>, vector<1x1xf32>,
    return
  }
}

</mosaic_0001>

<bundles_post_ra>
// kernel: tpu_custom_call.1
= control target key start
LH: loop header
LB: loop body
LE: loop exit
PB: predicated region body
PF: predicated region fallthrough
CT: control target
= control target key end

     0   :  { %9 = vsyncpa [#allocation3], 0  ;;  %s576_s0 = inlined_call_operand.hbm [shape: f32[8,1024], index: 0, kind: input, shape index: {}]   ;;  %s577_s1 = inlined_call_operand.hbm [shape: f32[8,1024], index: 1, kind: input, shape index: {}]   ;;  %s578_s2 = inlined_call_operand.vmem [shape: s32[8,1], index: 2, kind: input, shape index: {}]   ;;  %s579_s3 = inlined_call_operand.vmem [shape: s32[1,8], index: 3, kind: input, shape index: {}]   ;;  %s580_s4 = inlined_call_operand.hbm [shape: f32[1,1], index: 4, kind: output, shape index: {}]  }
   0x1   :  { %10 = vsyncpa [#allocation6], 0 }
   0x2   :  { %11 = vsyncpa [#allocation4], 0  ;;  %s17_s17 = sshll.u32 %s576_s0, 4  ;;  %s517_s18 = smov [#allocation2]   ;;  %s18_s17 = int_to_ptr.hbm [resolvable:$true] %s17_s17 }
   0x3   :  { %s19_s19 = sshll.u32 %s517_s18, 4  ;;  %s28_s22 = sshll.u32 %s577_s1, 4  ;;  %s20_s19 = int_to_ptr.vmem [resolvable:$true] %s19_s19  ;;  %s29_s22 = int_to_ptr.hbm [resolvable:$true] %s28_s22 }
   0x4   :  { %22 = dma.hbm_to_vmem [thread:$0]  %s18_s17, 1024, %s20_s19, [#allocation3]  }
   0x5   :  { %s518_s23 = smov [#allocation5]  }
   0x6   :  { %s30_s24 = sshll.u32 %s518_s23, 4  ;;  %s31_s24 = int_to_ptr.vmem [resolvable:$true] %s30_s24 }
   0x7   :  { %33 = dma.hbm_to_vmem [thread:$0]  %s29_s22, 1024, %s31_s24, [#allocation6]  }
   0x8   :  { %511 = dma.done.wait [#allocation3], 1024  }
   0x9   :  { %512 = vsyncadd [#allocation3], 4294966272 }
   0xa   :  { %513 = dma.done.wait [#allocation6], 1024  }
   0xb   :  { %514 = vsyncadd [#allocation6], 4294966272  ;;  %v56_v0 = vld [vmem:[#allocation5 + $0x10] sm:$0xff]  ;;  %v54_v1 = vld [vmem:[#allocation5] sm:$0xff]  ;;  %v519_v18 = vmov 0   ;;  %vm224_vm0 = vcmask 64512  }
   0xc   :  { %v55_v2 = vld [vmem:[#allocation5 + $0x8] sm:$0xff]  ;;  %117 = vmatpush.xpose.msra.mxu2 %v56_v0  ;;  %77 = vmatpush.xpose.msra.mxu0 %v54_v1  ;;  %v57_v3 = vld [vmem:[#allocation5 + $0x18] sm:$0xff]  ;;  %v48_v4 = vld [vmem:[#allocation2 + $0x10] sm:$0xff]  ;;  %v520_v63 = vmov 0.0   ;;  %s522_s26 = smov [#allocation7]   ;;  %s394_s30 = sshll.u32 %s580_s4, 4  ;;  %s395_s30 = int_to_ptr.hbm [resolvable:$true] %s394_s30 }
   0xd   :  { %v60_v5 = vld [vmem:[#allocation5 + $0x30] sm:$0xff]  ;;  %97 = vmatpush.xpose.msra.mxu1 %v55_v2  ;;  %137 = vmatpush.xpose.msra.mxu3 %v57_v3  ;;  %v46_v6 = vld [vmem:[#allocation2] sm:$0xff]  ;;  %v47_v7 = vld [vmem:[#allocation2 + $0x8] sm:$0xff]  ;;  %s392_s27 = sshll.u32 %s522_s26, 4  ;;  %s393_s27 = int_to_ptr.vmem [resolvable:$true] %s392_s27 }
   0xe   :  { %v49_v8 = vld [vmem:[#allocation2 + $0x18] sm:$0xff]  ;;  %v58_v9 = vld [vmem:[#allocation5 + $0x20] sm:$0xff]  ;;  %v59_v11 = vld [vmem:[#allocation5 + $0x28] sm:$0xff]  ;;  %418 = vset.pattern.permute.xlu1 %v519_v18  ;;  %419 = vset.pattern.permute.xlu0 %v519_v18 }
   0xf   :  { %v61_v10 = vld [vmem:[#allocation5 + $0x38] sm:$0xff]  ;;  %118 = vmatmul.f32.vlgmr.msra.gmra.mxu2 %v48_v4  ;;  %78 = vmatmul.f32.vlgmr.msra.gmra.mxu0 %v46_v6  ;;  %v52_v12 = vld [vmem:[#allocation2 + $0x30] sm:$0xff]  ;;  %v50_v13 = vld [vmem:[#allocation2 + $0x20] sm:$0xff] }
  0x10   :  { %197 = vmatpush.xpose.msrb.mxu2 %v60_v5  ;;  %98 = vmatmul.f32.vlgmr.msra.gmra.mxu1 %v47_v7  ;;  %v53_v14 = vld [vmem:[#allocation2 + $0x38] sm:$0xff]  ;;  %v51_v15 = vld [vmem:[#allocation2 + $0x28] sm:$0xff]  ;;  %v222_v19 = vld [vmem:[%s578_s2] sm:$0xff] }
  0x11   :  { %138 = vmatmul.f32.vlgmr.msra.gmra.mxu3 %v49_v8  ;;  %157 = vmatpush.xpose.msrb.mxu0 %v58_v9  ;;  %v420_v61 = vld [vmem:[%s579_s3] ss:$0 sm:$0xff] }
  0x12   :  { %217 = vmatpush.xpose.msrb.mxu3 %v61_v10  ;;  %177 = vmatpush.xpose.msrb.mxu1 %v59_v11 }
  0x13   :  { %296 = vperm.xlu1 %418, %v222_v19   ;;  %v521_v19 = vmov 8.0  }
  0x17   :  { %198 = vmatmul.f32.vlgmr.msrb.gmra.mxu2 %v52_v12  ;;  %158 = vmatmul.f32.vlgmr.msrb.gmra.mxu0 %v50_v13 }
  0x18   :  { %178 = vmatmul.f32.vlgmr.msrb.gmra.mxu1 %v51_v15 }
  0x19   :  { %218 = vmatmul.f32.vlgmr.msrb.gmra.mxu3 %v53_v14 }
  0x85   :  { %v297_v62 = vpop.permute.xlu1 %296 }
  0x86   :  { %vm299_vm5 = vcmp.eq.s32.totalorder %v297_v62, %v420_v61 }
  0x87   :  { %v563_v0 = vsel %vm299_vm5, 1.0, %v520_v63 }
  0x88   :  { %v302_v1 = vsel %vm224_vm0, %v563_v0, 0.0  ;;  %vm333_vm15 = vcmp.gt.f32.partialorder %v563_v0, 0.0 }
  0x89   :  { %303 = vadd.xlane.f32.xlu1 %v302_v1 }
  0x8c   :  { %v79_v16 = vpop.f32.mrf.mxu0 }
  0x8d   :  { %v99_v17 = vpop.f32.mrf.mxu1 }
  0x8e   :  { %v100_v20 = vadd.f32 %v99_v17, %v79_v16 }
  0x92   :  { %v119_v21 = vpop.f32.mrf.mxu2 }
  0x93   :  { %v120_v22 = vadd.f32 %v119_v21, %v100_v20 }
  0x94   :  { %v139_v23 = vpop.f32.mrf.mxu3  ;;  %v159_v24 = vpop.f32.mrf.mxu0 }
  0x95   :  { %v140_v25 = vadd.f32 %v139_v23, %v120_v22  ;;  %v179_v26 = vpop.f32.mrf.mxu1 }
  0x97   :  { %v160_v27 = vadd.f32 %v159_v24, %v140_v25 }
  0x99   :  { %v180_v28 = vadd.f32 %v179_v26, %v160_v27 }
  0x9a   :  { %v199_v29 = vpop.f32.mrf.mxu2 }
  0x9b   :  { %v200_v30 = vadd.f32 %v199_v29, %v180_v28 }
  0x9c   :  { %v219_v31 = vpop.f32.mrf.mxu3 }
  0x9d   :  { %v220_v32 = vadd.f32 %v219_v31, %v200_v30 }
  0x9f   :  { %v225_v33 = vsel %vm224_vm0, %v220_v32, -inf }
  0xa0   :  { %226 = vmax.xlane.f32.xlu0 %v225_v33  ;;  %v249_v34 = vrot.slane %v225_v33, 4 }
  0xa2   :  { %v250_v35 = vmax.f32 %v225_v33, %v249_v34 }
  0xa4   :  { %v251_v36 = vrot.slane %v250_v35, 2 }
  0xa6   :  { %v252_v37 = vmax.f32 %v250_v35, %v251_v36 }
  0xa8   :  { %v253_v38 = vrot.slane %v252_v37, 1 }
  0xaa   :  { %v254_v39 = vmax.f32 %v252_v37, %v253_v38 }
  0xac   :  { %v255_v40 = vsub.f32 %v220_v32, %v254_v39 }
  0xae   :  { %v256_v41 = vmul.f32 1.442695, %v255_v40 }
  0xb0   :  { %421 = vpow2.f32 %v256_v41 }
  0xb6   :  { %v422_v42 = vpop.eup %421 }
  0xb7   :  { %v258_v43 = vsel %vm224_vm0, %v422_v42, 0.0 }
  0xb8   :  { %v259_v44 = vrot.slane %v258_v43, 4 }
  0xba   :  { %v260_v45 = vadd.f32 %v259_v44, %v258_v43 }
  0xbc   :  { %v261_v46 = vrot.slane %v260_v45, 2 }
  0xbe   :  { %v262_v47 = vadd.f32 %v261_v46, %v260_v45 }
  0xc0   :  { %v263_v48 = vrot.slane %v262_v47, 1 }
  0xc2   :  { %v264_v49 = vadd.f32 %v263_v48, %v262_v47 }
  0xc4   :  { %423 = vrcp.f32 %v264_v49  ;;  %v276_v53 = vand.u32 2147483648, %v264_v49  ;;  %v274_v55 = vand.u32 2147483647, %v264_v49  ;;  %vm270_vm2 = vweird.f32 %v264_v49 }
  0xc6   :  { %v277_v57 = vor.u32 1.1754944e-38, %v276_v53  ;;  %vm275_vm4 = vcmp.eq.f32.partialorder %v274_v55, 8.507059e+37 }
  0xca   :  { %v424_v50 = vpop.eup %423 }
  0xcb   :  { %v266_v51 = vmul.f32 %v424_v50, %v264_v49  ;;  %vm271_vm1 = vweird.f32 %v424_v50 }
  0xcc   :  { %vm272_vm3 = vmor %vm270_vm2, %vm271_vm1  ;;  %vm372_vm1 = vcmask 57344  }
  0xcd   :  { %v267_v52 = vsub.f32 1.0, %v266_v51 }
  0xcf   :  { %v268_v54 = vmul.f32 %v424_v50, %v267_v52 }
  0xd1   :  { %v269_v56 = vadd.f32 %v424_v50, %v268_v54 }
  0xd3   :  { %v273_v58 = vsel %vm272_vm3, %v424_v50, %v269_v56 }
  0xd4   :  { %v278_v59 = vsel %vm275_vm4, %v277_v57, %v273_v58 }
  0xd5   :  { %v279_v60 = vmul.f32 %v422_v42, %v278_v59 }
  0xd7   :  { %406 = vmatpush.xpose.msk.msra.mxu0 %vm224_vm0, %v279_v60 }
  0xfc   :  { %v304_v25 = vpop.xlane.xlu1 %303 }
  0xfd   :  { %vm339_vm11 = vweird.f32 %v304_v25  ;;  %v345_v41 = vand.u32 2147483648, %v304_v25  ;;  %v343_v44 = vand.u32 2147483647, %v304_v25 }
  0xff   :  { %v346_v46 = vor.u32 1.1754944e-38, %v345_v41  ;;  %vm344_vm14 = vcmp.eq.f32.partialorder %v343_v44, 8.507059e+37 }
 0x113   :  { %v227_v2 = vpop.xlane.xlu0 %226 }
 0x114   :  { %v228_v3 = vsub.f32 %v220_v32, %v227_v2 }
 0x116   :  { %v229_v4 = vmul.f32 1.442695, %v228_v3 }
 0x118   :  { %425 = vpow2.f32 %v229_v4 }
 0x11e   :  { %v426_v5 = vpop.eup %425 }
 0x11f   :  { %v231_v6 = vsel %vm224_vm0, %v426_v5, 0.0 }
 0x120   :  { %232 = vadd.xlane.f32.xlu0 %v231_v6 }
 0x193   :  { %v233_v7 = vpop.xlane.xlu0 %232 }
 0x194   :  { %427 = vrcp.f32 %v233_v7  ;;  %v245_v11 = vand.u32 2147483648, %v233_v7  ;;  %v243_v13 = vand.u32 2147483647, %v233_v7  ;;  %vm239_vm7 = vweird.f32 %v233_v7 }
 0x195   :  { %429 = vrcp.f32 %v521_v19 }
 0x196   :  { %v246_v15 = vor.u32 1.1754944e-38, %v245_v11  ;;  %vm244_vm9 = vcmp.eq.f32.partialorder %v243_v13, 8.507059e+37  ;;  %431 = vrcp.f32 %v304_v25 }
 0x197   :  { %433 = vlog2.f32 %v304_v25 }
 0x19a   :  { %v428_v8 = vpop.eup %427 }
 0x19b   :  { %v235_v9 = vmul.f32 %v428_v8, %v233_v7  ;;  %vm240_vm6 = vweird.f32 %v428_v8  ;;  %v430_v22 = vpop.eup %429 }
 0x19c   :  { %vm241_vm8 = vmor %vm239_vm7, %vm240_vm6  ;;  %v288_v24 = vmul.f32 8.0, %v430_v22  ;;  %v432_v30 = vpop.eup %431  ;;  %vm292_vm10 = vweird.f32 %v430_v22 }
 0x19d   :  { %v236_v10 = vsub.f32 1.0, %v235_v9  ;;  %v335_v33 = vmul.f32 %v432_v30, %v304_v25  ;;  %vm340_vm12 = vweird.f32 %v432_v30  ;;  %v434_v45 = vpop.eup %433 }
 0x19e   :  { %v289_v27 = vsub.f32 1.0, %v288_v24  ;;  %vm341_vm13 = vmor %vm339_vm11, %vm340_vm12  ;;  %v350_v47 = vmul.f32 0.6931472, %v434_v45 }
 0x19f   :  { %v237_v12 = vmul.f32 %v428_v8, %v236_v10  ;;  %v336_v36 = vsub.f32 1.0, %v335_v33 }
 0x1a0   :  { %v290_v29 = vmul.f32 %v430_v22, %v289_v27  ;;  %v351_v53 = vsub.f32 0.0, %v350_v47 }
 0x1a1   :  { %v238_v14 = vadd.f32 %v428_v8, %v237_v12  ;;  %v337_v38 = vmul.f32 %v432_v30, %v336_v36 }
 0x1a2   :  { %v291_v32 = vadd.f32 %v430_v22, %v290_v29 }
 0x1a3   :  { %v242_v16 = vsel %vm241_vm8, %v428_v8, %v238_v14  ;;  %v338_v43 = vadd.f32 %v432_v30, %v337_v38 }
 0x1a4   :  { %v247_v17 = vsel %vm244_vm9, %v246_v15, %v242_v16  ;;  %v293_v35 = vsel %vm292_vm10, %v430_v22, %v291_v32 }
 0x1a5   :  { %v248_v18 = vmul.f32 %v426_v5, %v247_v17  ;;  %v342_v48 = vsel %vm341_vm13, %v432_v30, %v338_v43 }
 0x1a6   :  { %v347_v50 = vsel %vm344_vm14, %v346_v46, %v342_v48 }
 0x1a7   :  { %407 = vmatmul.msk.f32.vlgmr.msra.gmra.mxu0 %vm224_vm0, %v248_v18  ;;  %v280_v20 = vsel %vm224_vm0, %v248_v18, 0.0  ;;  %v348_v55 = vmul.f32 %v563_v0, %v347_v50 }
 0x1a8   :  { %v281_v21 = vrot.slane %v280_v20, 4 }
 0x1aa   :  { %v282_v23 = vadd.f32 %v281_v21, %v280_v20 }
 0x1ac   :  { %v283_v26 = vrot.slane %v282_v23, 2 }
 0x1ae   :  { %v284_v28 = vadd.f32 %v283_v26, %v282_v23 }
 0x1b0   :  { %v285_v31 = vrot.slane %v284_v28, 1 }
 0x1b2   :  { %v286_v34 = vadd.f32 %v285_v31, %v284_v28 }
 0x1b4   :  { %v294_v37 = vmul.f32 %v293_v35, %v286_v34 }
 0x1b6   :  { %v367_v40 = vadd.f32 1e-08, %v294_v37 }
 0x224   :  { %v328_v39 = vpop.f32.mrf.mxu0 }
 0x225   :  { %v329_v42 = vadd.f32 1e-08, %v328_v39 }
 0x227   :  { %435 = vlog2.f32 %v329_v42 }
 0x228   :  { %437 = vlog2.f32 %v367_v40 }
 0x22d   :  { %v436_v49 = vpop.eup %435 }
 0x22e   :  { %v438_v51 = vpop.eup %437  ;;  %v332_v52 = vmul.f32 0.6931472, %v436_v49 }
 0x22f   :  { %v369_v56 = vmul.f32 0.6931472, %v438_v51 }
 0x230   :  { %v352_v54 = vsub.f32 %v351_v53, %v332_v52 }
 0x231   :  { %v370_v60 = vsub.f32 -2.0794415, %v369_v56 }
 0x232   :  { %v353_v57 = vmul.f32 %v352_v54, %v348_v55 }
 0x233   :  { %v371_v61 = vmul.f32 0.125, %v370_v60 }
 0x234   :  { %v354_v58 = vsel %vm333_vm15, %v353_v57, 0.0 }
 0x235   :  { %v355_v59 = vsel %vm224_vm0, %v354_v58, 0.0  ;;  %v373_v62 = vsel %vm372_vm1, %v371_v61, 0.0  ;;  %vm385_vm0 = vcmask 0  }
 0x236   :  { %356 = vadd.xlane.f32.xlu2 %v355_v59 }
 0x23e   :  { %374 = vadd.xlane.f32.xlu2 %v373_v62 }
 0x2a9   :  { %v357_v63 = vpop.xlane.xlu2 %356 }
 0x2aa   :  { %v358_v1 = vrot.slane %v357_v63, 4 }
 0x2ac   :  { %v359_v2 = vadd.f32 %v358_v1, %v357_v63 }
 0x2ae   :  { %v360_v3 = vrot.slane %v359_v2, 2 }
 0x2b0   :  { %v361_v4 = vadd.f32 %v360_v3, %v359_v2 }
 0x2b1   :  { %v375_v5 = vpop.xlane.xlu2 %374 }
 0x2b2   :  { %v376_v6 = vrot.slane %v375_v5, 4  ;;  %v362_v7 = vrot.slane %v361_v4, 1 }
 0x2b4   :  { %v377_v8 = vadd.f32 %v376_v6, %v375_v5  ;;  %v363_v9 = vadd.f32 %v362_v7, %v361_v4 }
 0x2b6   :  { %v378_v0 = vrot.slane %v377_v8, 2  ;;  %408 = vpush %v363_v9 }
 0x2b8   :  { %v379_v10 = vadd.f32 %v378_v0, %v377_v8 }
 0x2ba   :  { %v380_v11 = vrot.slane %v379_v10, 1 }
 0x2bc   :  { %v381_v12 = vadd.f32 %v380_v11, %v379_v10 }
 0x2be   :  { %410 = vpush %v381_v12 }
 0x2e7   :  { %s409_s3 = spop %408 }
 0x2e8   :  { %v365_v13 = vstv %s409_s3 }
 0x2e9   :  { %v366_v14 = vmul.f32 %v365_v13, %v293_v35 }
 0x2ef   :  { %s411_s5 = spop %410 }
 0x2f0   :  { %v383_v15 = vstv %s411_s5 }
 0x2f1   :  { %v384_v16 = vadd.f32 %v383_v15, %v366_v14 }
 0x2f3   :  { %386 = vst.msk [vmem:[#allocation7] sm:$0x1] %vm385_vm0, %v384_v16 }
 0x2f4   :  { %397 = dma.vmem_to_hbm [thread:$0]  %s393_s27, 16, %s395_s30, [#allocation4]  }
 0x2f5   :  { %515 = dma.done.wait [#allocation4], 16  }
 0x2f6   :  { %516 = vsyncadd [#allocation4], 4294967280 }
 0x2f7   :  { %402 = vsyncpa [#allocation3], 1 }
 0x2f8   :  { %403 = vsyncpa [#allocation6], 1 }
 0x2f9   :  { %404 = vsyncpa [#allocation4], 1 }

</bundles_post_ra>
